<compile_context>
chip_gen: v6e
topology: v6e:2x2x1
jax: 0.10.0
libtpu: 0.0.40
codegen_flags: <defaults>
</compile_context>

<pallas_src>
import jax
import jax.numpy as jnp
from jax.experimental import pallas as pl
from jax.experimental.pallas import tpu as pltpu

NEG_INF = -1e30  # large-negative pad bias: exp(pad - max) == 0 in f32
LANE = 128       # TPU lane width; padded action dimension


def _cdiv(a, b):
    return -(-a // b)


def _round_up(a, m):
    return _cdiv(a, m) * m


def _orthogonal(key, shape, scale):
    """Deterministic orthogonal init matching nn.init.orthogonal_ semantics (up to RNG)."""
    rows, cols = shape
    a = jax.random.normal(key, (max(rows, cols), min(rows, cols)), dtype=jnp.float32)
    q, r = jnp.linalg.qr(a)
    q = q * jnp.sign(jnp.diagonal(r))  # sign-fix, same trick torch uses
    if rows < cols:
        q = q.T
    return (scale * q[:rows, :cols]).astype(jnp.float32)


def prepare_discrete_actor_params(w1, b1, w2, b2, a_pad=LANE):
    """One-time parameter preparation (NOT in the per-call hot path).

    w1: (hidden, in) torch layout, w2: (action_dim, hidden) torch layout.
    Returns weights pre-transposed to (in, out), action dim padded to `a_pad`
    lanes, matmul operands cast to bf16, biases kept f32 (pad bias = -1e30).
    """
    hidden, in_size = w1.shape
    a = w2.shape[0]
    assert a <= a_pad
    w1t = jnp.asarray(w1.T, dtype=jnp.bfloat16)                              # (in, H)
    b1r = jnp.asarray(b1, dtype=jnp.float32).reshape(1, hidden)              # (1, H)
    w2t = (jnp.zeros((hidden, a_pad), jnp.bfloat16)
           .at[:, :a].set(w2.T.astype(jnp.bfloat16)))                        # (H, 128)
    b2r = (jnp.full((1, a_pad), NEG_INF, jnp.float32)
           .at[0, :a].set(jnp.asarray(b2, jnp.float32)))                     # (1, 128)
    return dict(w1t=w1t, b1=b1r, w2t=w2t, b2=b2r,
                action_dim=a, a_pad=a_pad, in_size=in_size, hidden=hidden)


def discrete_actor_kernel(x_ref, w1_ref, b1_ref, w2_ref, b2_ref, out_ref):
    # fc1 + ReLU: bf16 MXU operands, f32 accumulation / elementwise.
    h = jnp.dot(x_ref[...].astype(jnp.bfloat16), w1_ref[...],
                preferred_element_type=jnp.float32)
    h = jnp.maximum(h + b1_ref[...], 0.0)
    # fc2 on the 128-lane-padded action dim; pad columns carry bias -1e30.
    logits = jnp.dot(h.astype(jnp.bfloat16), w2_ref[...],
                     preferred_element_type=jnp.float32) + b2_ref[...]
    # Categorical(logits).logits semantics: logp = logits - logsumexp(logits).
    # Pad columns contribute exp(-1e30 - m) == 0, so the normalizer is exact.
    m = jnp.max(logits, axis=-1, keepdims=True)
    lse = m + jnp.log(jnp.sum(jnp.exp(logits - m), axis=-1, keepdims=True))
    # Single lane-dense (tb, 128) f32 store: normalized log-probs only.
    out_ref[...] = logits - lse


def discrete_actor_forward(x, params, *, max_b_tile=2048, unpad=True):
    """x: (B, input_size) float32 or bfloat16.

    Returns normalized log-probs (== torch Categorical(logits).logits):
      unpad=True  -> (B, action_dim)
      unpad=False -> padded (b_padded, a_pad) slab (let the jitted caller slice/fuse).
    """
    w1t, b1, w2t, b2 = params["w1t"], params["b1"], params["w2t"], params["b2"]
    a, a_pad = params["action_dim"], params["a_pad"]
    in_size, hidden = params["in_size"], params["hidden"]
    B = x.shape[0]

    # Batch tiling: smallest tile count whose (8-row-aligned) tile fits max_b_tile,
    # then force >=2 grid steps when there are enough rows so v7x's second
    # TensorCore gets work ("parallel" axis). No overshoot padding beyond tile rounding.
    max_b_tile = max(8, _round_up(max_b_tile, 8))
    b_pad8 = _round_up(B, 8)
    num_tiles = _cdiv(b_pad8, max_b_tile)
    if num_tiles == 1 and b_pad8 >= 16:
        num_tiles = 2
    tb = _round_up(_cdiv(b_pad8, num_tiles), 8)
    b_padded = num_tiles * tb
    if b_padded != B:
        x = jnp.pad(x, ((0, b_padded - B), (0, 0)))

    cost = pl.CostEstimate(
        flops=2 * b_padded * (in_size * hidden + hidden * a_pad),
        transcendentals=b_padded * (a_pad + 1),
        bytes_accessed=(b_padded * in_size * x.dtype.itemsize   # x (f32 or bf16)
                        + w1t.size * 2 + w2t.size * 2           # weights (bf16)
                        + b1.size * 4 + b2.size * 4             # biases (f32)
                        + b_padded * a_pad * 4),                # log-prob slab (f32)
    )

    out = pl.pallas_call(
        discrete_actor_kernel,
        out_shape=jax.ShapeDtypeStruct((b_padded, a_pad), jnp.float32),
        grid_spec=pltpu.PrefetchScalarGridSpec(
            num_scalar_prefetch=0,
            grid=(num_tiles,),
            in_specs=[
                pl.BlockSpec((tb, in_size), lambda i: (i, 0)),       # x tile
                pl.BlockSpec((in_size, hidden), lambda i: (0, 0)),   # w1t (resident)
                pl.BlockSpec((1, hidden), lambda i: (0, 0)),         # b1  (resident)
                pl.BlockSpec((hidden, a_pad), lambda i: (0, 0)),     # w2t (resident)
                pl.BlockSpec((1, a_pad), lambda i: (0, 0)),          # b2  (resident)
            ],
            out_specs=pl.BlockSpec((tb, a_pad), lambda i: (i, 0)),
        ),
        compiler_params=pltpu.CompilerParams(
            dimension_semantics=("parallel",)),
        cost_estimate=cost,
    )(x, w1t, b1, w2t, b2)

    if not unpad:
        return out
    return out[:B, :a]


if __name__ == "__main__":
    B, INPUT_SIZE, HIDDEN, ACTION_DIM = 8, 32, 128, 6

    key = jax.random.PRNGKey(0)
    kx, k1, k2 = jax.random.split(key, 3)

    x = jax.random.normal(kx, (B, INPUT_SIZE), dtype=jnp.float32)

    # fc1: Linear(input_size, hidden) -> weight (hidden, input_size), orthogonal*2.0, bias 0
    w1 = _orthogonal(k1, (HIDDEN, INPUT_SIZE), scale=2.0)
    b1 = jnp.zeros((HIDDEN,), dtype=jnp.float32)
    # fc2: Linear(hidden, action_dim) -> weight (action_dim, hidden), orthogonal*0.01, bias 0
    w2 = _orthogonal(k2, (ACTION_DIM, HIDDEN), scale=0.01)
    b2 = jnp.zeros((ACTION_DIM,), dtype=jnp.float32)

    params = prepare_discrete_actor_params(w1, b1, w2, b2)

    # Jit the wrapper (params closed over) so the final unpad slice lives in the
    # same XLA program as the pallas_call instead of a separate HBM round trip.
    fwd = jax.jit(lambda xin: discrete_actor_forward(xin, params))
    logp = fwd(x)
    jax.block_until_ready(logp)

    # Reference with the same bf16 matmul-operand / f32-accumulation precision.
    h_ref = jnp.maximum(
        jnp.dot(x.astype(jnp.bfloat16), w1.T.astype(jnp.bfloat16),
                preferred_element_type=jnp.float32) + b1, 0.0)
    logits_ref = jnp.dot(h_ref.astype(jnp.bfloat16), w2.T.astype(jnp.bfloat16),
                         preferred_element_type=jnp.float32) + b2
    logp_ref = logits_ref - jax.scipy.special.logsumexp(logits_ref, axis=-1, keepdims=True)
    assert logp.shape == (B, ACTION_DIM), "unexpected output shape"
    assert jnp.allclose(logp, logp_ref, atol=1e-4), "log-prob mismatch (bf16 ref)"
    assert jnp.allclose(jnp.sum(jnp.exp(logp), axis=-1), 1.0, atol=1e-4), "probs not normalized"

    # Loose check against the pure-f32 PyTorch-module semantics
    # (Categorical(logits).logits == logits - logsumexp(logits)).
    h_f32 = jnp.maximum(x @ w1.T + b1, 0.0)
    logits_f32 = h_f32 @ w2.T + b2
    logp_f32 = logits_f32 - jax.scipy.special.logsumexp(logits_f32, axis=-1, keepdims=True)
    assert jnp.allclose(logp, logp_f32, atol=5e-3), "log-probs far from f32 reference"

    # Padded-slab path (what a fused jitted consumer would use) must agree too.
    logp_pad = jax.jit(lambda xin: discrete_actor_forward(xin, params, unpad=False))(x)
    jax.block_until_ready(logp_pad)
    assert jnp.allclose(logp_pad[:B, :ACTION_DIM], logp, atol=1e-6), "padded slab mismatch"

    # TODO(synk): torch.distributions.Categorical object itself (sample/entropy) is
    # left to the caller; the kernel returns its defining normalized log-probs.
    print("KERNEL_OK")
</pallas_src>

<mosaic_0001>
module attributes {stable_mosaic.version = 11 : i64} {
  func.func @discrete_actor_kernel(%arg0: i32, %arg1: memref<8x32xf32, #tpu.memory_space<vmem>>, %arg2: memref<32x128xbf16, #tpu.memory_space<vmem>>, %arg3: memref<1x128xf32, #tpu.memory_space<vmem>>, %arg4: memref<128x128xbf16, #tpu.memory_space<vmem>>, %arg5: memref<1x128xf32, #tpu.memory_space<vmem>>, %arg6: memref<8x128xf32, #tpu.memory_space<vmem>>) attributes {dimension_semantics = [#tpu.dimension_semantics<parallel>], iteration_bounds = array<i64: 1>, scalar_prefetch = 0 : i64, scratch_operands = 0 : i64, tpu.core_type = #tpu.core_type<tc>, window_params = [{transform_indices = @transform_0, window_bounds = array<i64: 8, 32>}, {pipeline_mode = #tpu.pipeline_mode<synchronous>, transform_indices = @transform_1, window_bounds = array<i64: 32, 128>}, {pipeline_mode = #tpu.pipeline_mode<synchronous>, transform_indices = @transform_2, window_bounds = array<i64: 1, 128>}, {pipeline_mode = #tpu.pipeline_mode<synchronous>, transform_indices = @transform_3, window_bounds = array<i64: 128, 128>}, {pipeline_mode = #tpu.pipeline_mode<synchronous>, transform_indices = @transform_4, window_bounds = array<i64: 1, 128>}, {transform_indices = @transform_5, window_bounds = array<i64: 8, 128>}]} {
    %c0 = arith.constant 0 : index
    %c0_0 = arith.constant 0 : index
    %0 = vector.load %arg1[%c0, %c0_0] : memref<8x32xf32, #tpu.memory_space<vmem>>, vector<8x32xf32>
    %1 = arith.truncf %0 : vector<8x32xf32> to vector<8x32xbf16>
    %c0_1 = arith.constant 0 : index
    %c0_2 = arith.constant 0 : index
    %2 = vector.load %arg2[%c0_1, %c0_2] : memref<32x128xbf16, #tpu.memory_space<vmem>>, vector<32x128xbf16>
    %cst = arith.constant dense<0.000000e+00> : vector<8x128xf32>
    %3 = tpu.matmul %1, %2, %cst {dimension_numbers = #tpu.dot_dimension_numbers<[1], [0], [0], [1], [0, 0, 1, 1], [], []>} : vector<8x32xbf16>, vector<32x128xbf16>, vector<8x128xf32> -> vector<8x128xf32>
    %c0_3 = arith.constant 0 : index
    %c0_4 = arith.constant 0 : index
    %4 = vector.load %arg3[%c0_3, %c0_4] : memref<1x128xf32, #tpu.memory_space<vmem>>, vector<1x128xf32>
    %5 = vector.broadcast %4 : vector<1x128xf32> to vector<8x128xf32>
    %6 = arith.addf %3, %5 : vector<8x128xf32>
    %cst_5 = arith.constant 0.000000e+00 : f32
    %7 = vector.broadcast %cst_5 : f32 to vector<8x128xf32>
    %8 = arith.maximumf %6, %7 : vector<8x128xf32>
    %9 = arith.truncf %8 : vector<8x128xf32> to vector<8x128xbf16>
    %c0_6 = arith.constant 0 : index
    %c0_7 = arith.constant 0 : index
    %10 = vector.load %arg4[%c0_6, %c0_7] : memref<128x128xbf16, #tpu.memory_space<vmem>>, vector<128x128xbf16>
    %cst_8 = arith.constant dense<0.000000e+00> : vector<8x128xf32>
    %11 = tpu.matmul %9, %10, %cst_8 {dimension_numbers = #tpu.dot_dimension_numbers<[1], [0], [0], [1], [0, 0, 1, 1], [], []>} : vector<8x128xbf16>, vector<128x128xbf16>, vector<8x128xf32> -> vector<8x128xf32>
    %c0_9 = arith.constant 0 : index
    %c0_10 = arith.constant 0 : index
    %12 = vector.load %arg5[%c0_9, %c0_10] : memref<1x128xf32, #tpu.memory_space<vmem>>, vector<1x128xf32>
    %13 = vector.broadcast %12 : vector<1x128xf32> to vector<8x128xf32>
    %14 = arith.addf %11, %13 : vector<8x128xf32>
    %cst_11 = arith.constant dense<0xFF800000> : vector<8xf32>
    %15 = vector.multi_reduction <maximumf>, %14, %cst_11 [1] : vector<8x128xf32> to vector<8xf32>
    %16 = vector.shape_cast %15 : vector<8xf32> to vector<8x1xf32>
    %17 = vector.broadcast %16 : vector<8x1xf32> to vector<8x128xf32>
    %18 = arith.subf %14, %17 : vector<8x128xf32>
    %19 = math.exp %18 : vector<8x128xf32>
    %cst_12 = arith.constant dense<0.000000e+00> : vector<8xf32>
    %20 = vector.multi_reduction <add>, %19, %cst_12 [1] : vector<8x128xf32> to vector<8xf32>
    %21 = vector.shape_cast %20 : vector<8xf32> to vector<8x1xf32>
    %22 = math.log %21 : vector<8x1xf32>
    %23 = arith.addf %16, %22 : vector<8x1xf32>
    %24 = vector.broadcast %23 : vector<8x1xf32> to vector<8x128xf32>
    %25 = arith.subf %14, %24 : vector<8x128xf32>
    %c0_13 = arith.constant 0 : index
    %c0_14 = arith.constant 0 : index
    %26 = vector.load %arg6[%c0_13, %c0_14] : memref<8x128xf32, #tpu.memory_space<vmem>>, vector<8x128xf32>
    tpu.vector_store %arg6[%c0_13, %c0_14], %25 {strides = array<i32>} : memref<8x128xf32, #tpu.memory_space<vmem>>, vector<8x128xf32>,
    return
  }
  func.func @transform_0(%arg0: i32) -> (i32, i32) {
    %c0_i32 = arith.constant 0 : i32
    %c0_i32_0 = arith.constant 0 : i32
    return %arg0, %c0_i32 : i32, i32
  }
  func.func @transform_1(%arg0: i32) -> (i32, i32) {
    %c0_i32 = arith.constant 0 : i32
    %c0_i32_0 = arith.constant 0 : i32
    %c0_i32_1 = arith.constant 0 : i32
    return %c0_i32, %c0_i32_0 : i32, i32
  }
  func.func @transform_2(%arg0: i32) -> (i32, i32) {
    %c0_i32 = arith.constant 0 : i32
    %c0_i32_0 = arith.constant 0 : i32
    %c0_i32_1 = arith.constant 0 : i32
    return %c0_i32, %c0_i32_0 : i32, i32
  }
  func.func @transform_3(%arg0: i32) -> (i32, i32) {
    %c0_i32 = arith.constant 0 : i32
    %c0_i32_0 = arith.constant 0 : i32
    %c0_i32_1 = arith.constant 0 : i32
    return %c0_i32, %c0_i32_0 : i32, i32
  }
  func.func @transform_4(%arg0: i32) -> (i32, i32) {
    %c0_i32 = arith.constant 0 : i32
    %c0_i32_0 = arith.constant 0 : i32
    %c0_i32_1 = arith.constant 0 : i32
    return %c0_i32, %c0_i32_0 : i32, i32
  }
  func.func @transform_5(%arg0: i32) -> (i32, i32) {
    %c0_i32 = arith.constant 0 : i32
    %c0_i32_0 = arith.constant 0 : i32
    return %arg0, %c0_i32 : i32, i32
  }
}

</mosaic_0001>

<bundles_post_ra>
// kernel: _lambda_.1
= control target key start
LH: loop header
LB: loop body
LE: loop exit
PB: predicated region body
PF: predicated region fallthrough
CT: control target
= control target key end

     0   :  { %10 = vsyncpa [#allocation3], 0  ;;  %s488_s0 = inlined_call_operand.hbm [shape: f32[8,32], index: 0, kind: input, shape index: {}]   ;;  %s489_s1 = inlined_call_operand.hbm [shape: bf16[32,128], index: 1, kind: input, shape index: {}]   ;;  %s490_s2 = inlined_call_operand.vmem [shape: f32[1,128], index: 2, kind: input, shape index: {}]   ;;  %s491_s3 = inlined_call_operand.hbm [shape: bf16[128,128], index: 3, kind: input, shape index: {}]   ;;  %s492_s4 = inlined_call_operand.vmem [shape: f32[1,128], index: 4, kind: input, shape index: {}]   ;;  %s493_s5 = inlined_call_operand.hbm [shape: f32[8,128], index: 5, kind: output, shape index: {}]  }
   0x1   :  { %11 = vsyncpa [#allocation6], 0 }
   0x2   :  { %12 = vsyncpa [#allocation4], 0  ;;  %s432_s18 = smov [#allocation5]  }
   0x3   :  { %s28_s19 = sshll.u32 %s432_s18, 4  ;;  %s29_s19 = int_to_ptr.vmem [resolvable:$true] %s28_s19 }
   0x4   :  { %s354_s20 = scalar_lea.vmem %s29_s19, 256  ;;  %p359_p1 = scmp.lt.s32.totalorder %s29_s19, %s29_s19 }
   0x5   :  { %p355_p0 = scmp.ne.s32.totalorder %s29_s19, %s354_s20  ;;  %p360_p2 = scmp.lt.s32.totalorder %s354_s20, %s354_s20 }
   0x7   :  { %p361_p3 = por %p360_p2, %p359_p1 }
   0x9   :  { %p362_p4 = pnand %p361_p3, %p355_p0 }
   0xb   :  { %365 = shalt.err (!%p362_p4)
}
   0xc   :  { %s433_s21 = smov 64   ;;  %s434_s22 = smov 4  }
   0xd   :  { %34 = dma.hbm_to_vmem [thread:$0]  %s489_s1, 256, %s29_s19, [#allocation6], %s433_s21, %s433_s21, %s434_s22  }
   0xe   :  { %s435_s25 = smov [#allocation2]   ;;  %s436_s27 = smov [#allocation7]  }
   0xf   :  { %s19_s26 = sshll.u32 %s435_s25, 4  ;;  %s42_s28 = sshll.u32 %s436_s27, 4  ;;  %s20_s26 = int_to_ptr.vmem [resolvable:$true] %s19_s26  ;;  %s43_s28 = int_to_ptr.vmem [resolvable:$true] %s42_s28 }
  0x10   :  { %s374_s29 = scalar_lea.vmem %s20_s26, 128  ;;  %p379_p6 = scmp.lt.s32.totalorder %s20_s26, %s20_s26 }
  0x11   :  { %p375_p5 = scmp.ne.s32.totalorder %s20_s26, %s374_s29  ;;  %p380_p7 = scmp.lt.s32.totalorder %s374_s29, %s374_s29 }
  0x13   :  { %p381_p8 = por %p380_p7, %p379_p6 }
  0x15   :  { %p382_p9 = pnand %p381_p8, %p375_p5 }
  0x17   :  { %385 = shalt.err (!%p382_p9)
}
  0x18   :  { %22 = dma.hbm_to_vmem [thread:$0]  %s488_s0, 128, %s20_s26, [#allocation3]  }
  0x19   :  { %s394_s7 = scalar_lea.vmem %s43_s28, 1024  ;;  %p399_p11 = scmp.lt.s32.totalorder %s43_s28, %s43_s28 }
  0x1a   :  { %p395_p10 = scmp.ne.s32.totalorder %s43_s28, %s394_s7  ;;  %p400_p12 = scmp.lt.s32.totalorder %s394_s7, %s394_s7 }
  0x1c   :  { %p401_p13 = por %p400_p12, %p399_p11 }
  0x1e   :  { %p402_p0 = pnand %p401_p13, %p395_p10 }
  0x20   :  { %405 = shalt.err (!%p402_p0)
}
  0x21   :  { %48 = dma.hbm_to_vmem [thread:$0]  %s491_s3, 1024, %s43_s28, [#allocation6], %s433_s21, %s433_s21, %s434_s22  }
  0x22   :  { %426 = dma.done.wait [#allocation3], 128  }
  0x23   :  { %427 = vsyncadd [#allocation3], 4294967168 }
  0x24   :  { %428 = dma.done.wait [#allocation6], 1280  }
  0x25   :  { %429 = vsyncadd [#allocation6], 4294966016  ;;  %v437_v0 = vmov 0.0   ;;  %vm438_vm0 = vmmov 0   ;;  %v332_v1 = vld [vmem:[#allocation5 + $0x8] sm:$0xff]   ;;  %v333_v2 = vld [vmem:[#allocation5] sm:$0xff]  }
  0x26   :  { %296 = vmatprep.subr.bf16.mxu0 %v437_v0  ;;  %300 = vmatprep.mubr.msk.bf16.mxu0 %vm438_vm0, %v437_v0  ;;  %v61_v3 = vld [vmem:[#allocation2] sm:$0xff]  ;;  %v334_v4 = vld [vmem:[#allocation7 + $0x38] sm:$0xff]   ;;  %v335_v6 = vld [vmem:[#allocation7 + $0x30] sm:$0xff]   ;;  %vm86_vm1 = vcmask 261120  }
  0x27   :  { %304 = vmatprep.subr.bf16.mxu1 %v437_v0  ;;  %320 = vmatprep.mubr.msk.bf16.mxu1 %vm438_vm0, %v437_v0  ;;  %v62_v5 = vpack.c.bf16 %v61_v3, %v61_v3  ;;  %v336_v7 = vld [vmem:[#allocation7 + $0x28] sm:$0xff]   ;;  %v337_v8 = vld [vmem:[#allocation7 + $0x20] sm:$0xff]   ;;  %v338_v9 = vld [vmem:[#allocation7 + $0x18] sm:$0xff]  }
  0x28   :  { %297 = vmatpush3.bf16.msra.mxu0 %v332_v1  ;;  %305 = vmatpush3.bf16.msra.mxu1 %v334_v4  ;;  %v339_v10 = vld [vmem:[#allocation7 + $0x10] sm:$0xff]   ;;  %v340_v11 = vld [vmem:[#allocation7 + $0x8] sm:$0xff]   ;;  %v341_v12 = vld [vmem:[#allocation7] sm:$0xff]  }
  0x29   :  { %298 = vmatprep.subr.bf16.mxu0 %v437_v0  ;;  %306 = vmatprep.subr.bf16.mxu1 %v437_v0  ;;  %v271_v13 = vld [vmem:[%s490_s2] ss:$0 sm:$0xff]  ;;  %s439_s2 = smov [#allocation8]  }
  0x2a   :  { %v275_v21 = vld [vmem:[%s492_s4] ss:$0 sm:$0xff]  ;;  %s261_s11 = sshll.u32 %s439_s2, 4  ;;  %s262_s11 = int_to_ptr.vmem [resolvable:$true] %s261_s11 }
  0x2b   :  { %s406_s4 = scalar_lea.vmem %s262_s11, 128  ;;  %p411_p2 = scmp.lt.s32.totalorder %s262_s11, %s262_s11 }
  0x2c   :  { %299 = vmatpush3.bf16.msra.mxu0 %v333_v2  ;;  %307 = vmatpush3.bf16.msra.mxu1 %v335_v6  ;;  %p407_p1 = scmp.ne.s32.totalorder %s262_s11, %s406_s4  ;;  %p412_p3 = scmp.lt.s32.totalorder %s406_s4, %s406_s4 }
  0x2d   :  { %308 = vmatprep.subr.bf16.mxu1 %v437_v0 }
  0x2e   :  { %p413_p4 = por %p412_p3, %p411_p2 }
  0x2f   :  { %301 = vmatmul.mubr.msk.bf16.vlgmr.msra.gmra.mxu0 %vm86_vm1, %v62_v5 }
  0x30   :  { %309 = vmatpush3.bf16.msra.mxu1 %v336_v7  ;;  %p414_p5 = pnand %p413_p4, %p407_p1 }
  0x31   :  { %310 = vmatprep.subr.bf16.mxu1 %v437_v0 }
  0x34   :  { %311 = vmatpush3.bf16.msra.mxu1 %v337_v8 }
  0x35   :  { %312 = vmatprep.subr.bf16.mxu1 %v437_v0 }
  0x38   :  { %313 = vmatpush3.bf16.msra.mxu1 %v338_v9 }
  0x39   :  { %314 = vmatprep.subr.bf16.mxu1 %v437_v0 }
  0x3c   :  { %315 = vmatpush3.bf16.msra.mxu1 %v339_v10 }
  0x3d   :  { %316 = vmatprep.subr.bf16.mxu1 %v437_v0 }
  0x40   :  { %317 = vmatpush3.bf16.msra.mxu1 %v340_v11 }
  0x41   :  { %318 = vmatprep.subr.bf16.mxu1 %v437_v0 }
  0x44   :  { %319 = vmatpush3.bf16.msra.mxu1 %v341_v12 }
  0xef   :  { %v124_v14 = vpop.f32.mrf.mxu0 }
  0xf0   :  { %v125_v15 = vadd.f32 %v271_v13, %v124_v14 }
  0xf1   :  { %v302_v16 = vpop.f32.mrf.mxu0 }
  0xf2   :  { %v130_v17 = vmax.f32 %v125_v15, 0.0 }
  0xf3   :  { %v127_v18 = vpop.f32.mrf.mxu0 }
  0xf4   :  { %v131_v19 = vpack.c.bf16 %v130_v17, %v130_v17 }
  0xf5   :  { %v303_v20 = vpop.f32.mrf.mxu0 }
  0xf6   :  { %321 = vmatmul.mubr.bf16.vlgmr.msra.gmra.mxu1 %v131_v19 }
 0x1b6   :  { %v237_v22 = vpop.f32.mrf.mxu1 }
 0x1b7   :  { %v238_v23 = vadd.f32 %v275_v21, %v237_v22 }
 0x1b8   :  { %v322_v24 = vpop.f32.mrf.mxu1 }
 0x1b9   :  { %243 = vmax.xlane.f32.xlu0 %v238_v23 }
 0x1ba   :  { %v240_v25 = vpop.f32.mrf.mxu1 }
 0x1bc   :  { %v323_v26 = vpop.f32.mrf.mxu1 }
 0x242   :  { %v244_v27 = vpop.xlane.xlu0 %243 }
 0x243   :  { %v245_v28 = vsub.f32 %v238_v23, %v244_v27 }
 0x245   :  { %v246_v29 = vmul.f32 1.442695, %v245_v28 }
 0x247   :  { %342 = vpow2.f32 %v246_v29 }
 0x254   :  { %v343_v30 = vpop.eup %342 }
 0x255   :  { %248 = vadd.xlane.f32.xlu0 %v343_v30 }
 0x2de   :  { %v249_v31 = vpop.xlane.xlu0 %248 }
 0x2df   :  { %344 = vlog2.f32 %v249_v31 }
 0x2ec   :  { %v345_v32 = vpop.eup %344 }
 0x2ed   :  { %v251_v33 = vmul.f32 0.6931472, %v345_v32 }
 0x2ef   :  { %v252_v34 = vadd.f32 %v251_v33, %v244_v27 }
 0x2f1   :  { %v253_v35 = vsub.f32 %v238_v23, %v252_v34 }
 0x2f3   :  { %254 = vst [vmem:[#allocation8] sm:$0xff] %v253_v35 }
 0x2f4   :  { %417 = shalt.err (!%p414_p5)
}
 0x2f5   :  { %264 = dma.vmem_to_hbm [thread:$0]  %s262_s11, 128, %s493_s5, [#allocation4]  }
 0x2f6   :  { %430 = dma.done.wait [#allocation4], 128  }
 0x2f7   :  { %431 = vsyncadd [#allocation4], 4294967168 }
 0x2f8   :  { %268 = vsyncpa [#allocation3], 1 }
 0x2f9   :  { %269 = vsyncpa [#allocation6], 1 }
 0x2fa   :  { %270 = vsyncpa [#allocation4], 1 }

</bundles_post_ra>
